<compile_context>
chip_gen: v7x
topology: tpu7x:2x2x1
jax: 0.10.0
libtpu: 0.0.40
codegen_flags: <defaults>
</compile_context>

<pallas_src>
import jax
import jax.numpy as jnp
from jax.experimental import pallas as pl
from jax.experimental.pallas import tpu as pltpu


def _linear_hsig_kernel(x_ref, p_ref, o_ref):
    # x_ref : (B, IN)     f32, SMEM  -- read as scalars
    # p_ref : (IN+1, OUT) f32, VMEM  -- rows 0..IN-1 = W^T/6, row IN = (b+3)/6
    # o_ref : (B, OUT)    f32, VMEM
    k_in = p_ref.shape[0] - 1
    bias = p_ref[k_in:k_in + 1, :]                       # (1, OUT), pre-folded

    for row in range(o_ref.shape[0]):                    # static; B=1 in spec
        y = bias
        for k in range(k_in):                            # static; K=3 unrolled
            # scalar (sreg) * (1, OUT) vreg row: pure VPU broadcast-FMA.
            y = y + x_ref[row, k] * p_ref[k:k + 1, :]
        # Epilogue reduced to a single clamp (constants folded at init).
        o_ref[row:row + 1, :] = jnp.clip(y, 0.0, 1.0).astype(o_ref.dtype)


def prepare_linear_params(weight, bias):
    """One-time (init-time) parameter prep; cached by the caller.

    torch nn.Linear stores weight as (OUT, IN).  We transpose to (IN, OUT),
    fold the hardsigmoid affine transform ((y + 3) / 6) into the parameters,
    and pack weight + bias into one (IN+1, OUT) array so the kernel takes a
    single parameter operand (one fewer DMA per call).
    """
    w_scaled = (weight.T / 6.0).astype(jnp.float32)           # (IN, OUT)
    b_scaled = ((bias + 3.0) / 6.0).astype(jnp.float32)       # (OUT,)
    packed = jnp.concatenate([w_scaled, b_scaled[None, :]], axis=0)
    return packed                                             # (IN+1, OUT)


def linear_hardsigmoid(x, params):
    """x: (B, IN) f32; params: (IN+1, OUT) f32 from prepare_linear_params."""
    out_features = params.shape[1]
    return pl.pallas_call(
        _linear_hsig_kernel,
        out_shape=jax.ShapeDtypeStruct((x.shape[0], out_features), jnp.float32),
        in_specs=[
            pl.BlockSpec(memory_space=pltpu.SMEM),   # x -> scalar path
            pl.BlockSpec(memory_space=pltpu.VMEM),   # packed W^T/6 ; (b+3)/6
        ],
        out_specs=pl.BlockSpec(memory_space=pltpu.VMEM),
    )(x, params)


def _reference(x, weight, bias):
    y = x @ weight.T + bias
    y = y + 3.0
    y = jnp.clip(y, 0.0, 6.0)
    return y / 6.0


if __name__ == "__main__":
    B, IN, OUT = 1, 3, 8   # from the PyTorch spec: x2 = torch.randn(1, 3), Linear(3, 8)

    key = jax.random.PRNGKey(0)
    kx, kw, kb = jax.random.split(key, 3)

    # Deterministic nn.Linear-style init: U(-1/sqrt(IN), 1/sqrt(IN))
    bound = 1.0 / jnp.sqrt(jnp.float32(IN))
    weight = jax.random.uniform(kw, (OUT, IN), jnp.float32, -bound, bound)
    bias = jax.random.uniform(kb, (OUT,), jnp.float32, -bound, bound)

    x2 = jax.random.normal(kx, (B, IN), jnp.float32)

    # Init-time (once) parameter packing/folding; reused across calls.
    params = prepare_linear_params(weight, bias)

    out = linear_hardsigmoid(x2, params)
    out = jax.block_until_ready(out)

    ref = _reference(x2, weight, bias)
    assert out.shape == (B, OUT), out.shape
    assert jnp.allclose(out, ref, atol=1e-5, rtol=1e-5), (out, ref)

    print("KERNEL_OK")
</pallas_src>

<mosaic_0001>
module attributes {stable_mosaic.version = 11 : i64} {
  func.func @_linear_hsig_kernel(%arg0: memref<1x3xf32, #tpu.memory_space<smem>>, %arg1: memref<4x8xf32, #tpu.memory_space<vmem>>, %arg2: memref<1x8xf32, #tpu.memory_space<vmem>>) attributes {dimension_semantics = [], scalar_prefetch = 0 : i64, scratch_operands = 0 : i64, tpu.core_type = #tpu.core_type<tc>} {
    %c3 = arith.constant 3 : index
    %c0 = arith.constant 0 : index
    %0 = vector.load %arg1[%c3, %c0] : memref<4x8xf32, #tpu.memory_space<vmem>>, vector<1x8xf32>
    %c0_0 = arith.constant 0 : index
    %c0_1 = arith.constant 0 : index
    %1 = memref.load %arg0[%c0_0, %c0_1] : memref<1x3xf32, #tpu.memory_space<smem>>
    %c0_2 = arith.constant 0 : index
    %c0_3 = arith.constant 0 : index
    %2 = vector.load %arg1[%c0_2, %c0_3] : memref<4x8xf32, #tpu.memory_space<vmem>>, vector<1x8xf32>
    %3 = vector.broadcast %1 : f32 to vector<1x8xf32>
    %4 = arith.mulf %3, %2 : vector<1x8xf32>
    %5 = arith.addf %0, %4 : vector<1x8xf32>
    %c0_4 = arith.constant 0 : index
    %c1 = arith.constant 1 : index
    %6 = memref.load %arg0[%c0_4, %c1] : memref<1x3xf32, #tpu.memory_space<smem>>
    %c1_5 = arith.constant 1 : index
    %c0_6 = arith.constant 0 : index
    %7 = vector.load %arg1[%c1_5, %c0_6] : memref<4x8xf32, #tpu.memory_space<vmem>>, vector<1x8xf32>
    %8 = vector.broadcast %6 : f32 to vector<1x8xf32>
    %9 = arith.mulf %8, %7 : vector<1x8xf32>
    %10 = arith.addf %5, %9 : vector<1x8xf32>
    %c0_7 = arith.constant 0 : index
    %c2 = arith.constant 2 : index
    %11 = memref.load %arg0[%c0_7, %c2] : memref<1x3xf32, #tpu.memory_space<smem>>
    %c2_8 = arith.constant 2 : index
    %c0_9 = arith.constant 0 : index
    %12 = vector.load %arg1[%c2_8, %c0_9] : memref<4x8xf32, #tpu.memory_space<vmem>>, vector<1x8xf32>
    %13 = vector.broadcast %11 : f32 to vector<1x8xf32>
    %14 = arith.mulf %13, %12 : vector<1x8xf32>
    %15 = arith.addf %10, %14 : vector<1x8xf32>
    %cst = arith.constant 0.000000e+00 : f32
    %cst_10 = arith.constant 1.000000e+00 : f32
    %16 = vector.broadcast %cst : f32 to vector<1x8xf32>
    %17 = arith.maximumf %16, %15 : vector<1x8xf32>
    %18 = vector.broadcast %cst_10 : f32 to vector<1x8xf32>
    %19 = arith.minimumf %18, %17 : vector<1x8xf32>
    %c0_11 = arith.constant 0 : index
    %c0_12 = arith.constant 0 : index
    %20 = vector.load %arg2[%c0_11, %c0_12] : memref<1x8xf32, #tpu.memory_space<vmem>>, vector<1x8xf32>
    tpu.vector_store %arg2[%c0_11, %c0_12], %19 {strides = array<i32>} : memref<1x8xf32, #tpu.memory_space<vmem>>, vector<1x8xf32>,
    return
  }
}

</mosaic_0001>

<bundles_post_ra>
// kernel: tpu_custom_call.1
= control target key start
LH: loop header
LB: loop body
LE: loop exit
PB: predicated region body
PF: predicated region fallthrough
CT: control target
= control target key end

     0   :  { %7 = vsyncpa [#allocation5], 0  ;;  %s190_s0 = inlined_call_operand.hbm [shape: f32[1,3], index: 0, kind: input, shape index: {}]   ;;  %s191_s1 = inlined_call_operand.hbm [shape: f32[4,8], index: 1, kind: input, shape index: {}]   ;;  %s192_s2 = inlined_call_operand.hbm [shape: f32[1,8], index: 2, kind: output, shape index: {}]  }
   0x1   :  { %8 = vsyncpa [#allocation3], 0 }
   0x2   :  { %9 = vsyncpa [#allocation4], 0  ;;  %s76_s11 = scalar_lea.hbm %s190_s0, 16 }
   0x3   :  { %p77_p0 = scmp.ne.s32.totalorder %s190_s0, %s76_s11  ;;  %p80_p1 = scmp.lt.u32.totalorder %s76_s11, %s190_s0 }
   0x5   :  { %p82_p2 = pnand %p80_p1, %p77_p0 }
   0x7   :  { %85 = shalt.err (!%p82_p2)
}
   0x8   :  { %s136_s16 = smov [#allocation2]   ;;  %s137_s19 = smov [#allocation6]  }
   0x9   :  { %17 = dma.hbm_to_smem %s190_s0, 16, %s136_s16, [#allocation5]  }
   0xa   :  { %s24_s20 = sshll.u32 %s137_s19, 4  ;;  %s86_s23 = scalar_lea.hbm %s191_s1, 64  ;;  %s25_s20 = int_to_ptr.vmem [resolvable:$true] %s24_s20 }
   0xb   :  { %p87_p3 = scmp.ne.s32.totalorder %s191_s1, %s86_s23  ;;  %p90_p4 = scmp.lt.u32.totalorder %s86_s23, %s191_s1 }
   0xd   :  { %p92_p5 = pnand %p90_p4, %p87_p3 }
   0xf   :  { %95 = shalt.err (!%p92_p5)
}
  0x10   :  { %s96_s28 = scalar_lea.vmem %s25_s20, 64  ;;  %p101_p7 = scmp.lt.s32.totalorder %s25_s20, %s25_s20 }
  0x11   :  { %p97_p6 = scmp.ne.s32.totalorder %s25_s20, %s96_s28  ;;  %p102_p8 = scmp.lt.s32.totalorder %s96_s28, %s96_s28 }
  0x13   :  { %p103_p9 = por %p102_p8, %p101_p7 }
  0x15   :  { %p104_p10 = pnand %p103_p9, %p97_p6 }
  0x17   :  { %107 = shalt.err (!%p104_p10)
}
  0x18   :  { %27 = dma.hbm_to_vmem [thread:$0]  %s191_s1, 64, %s25_s20, [#allocation3]  }
  0x19   :  { %130 = dma.done.wait [#allocation5], 16  }
  0x1a   :  { %131 = vsyncadd [#allocation5], 4294967280 }
  0x1b   :  { %132 = dma.done.wait [#allocation3], 64  }
  0x1c   :  { %133 = vsyncadd [#allocation3], 4294967232 }
  0x1d   :  { %34 = sfence }
  0x1e   :  { %s36_s30 = sld [smem:[#allocation2]]  ;;  %s71_s3 = sld [smem:[#allocation2 + $0x1]]  ;;  %v37_v0 = vld [vmem:[#allocation6] sm:$0x1]  ;;  %v42_v1 = vld [vmem:[#allocation6 + $0x1] sm:$0x1] }
  0x1f   :  { %s72_s4 = sld [smem:[#allocation2 + $0x2]]  ;;  %v35_v2 = vld [vmem:[#allocation6 + $0x3] sm:$0x1]  ;;  %v47_v4 = vld [vmem:[#allocation6 + $0x2] sm:$0x1]  ;;  %s138_s1 = smov [#allocation7]  }
  0x20   :  { %s61_s5 = sshll.u32 %s138_s1, 4  ;;  %vm53_vm0 = vcmask 57344   ;;  %s62_s5 = int_to_ptr.vmem [resolvable:$true] %s61_s5 }
  0x21   :  { %s108_s6 = scalar_lea.vmem %s62_s5, 16  ;;  %s112_s7 = scalar_lea.vmem %s62_s5, 32 }
  0x22   :  { %p109_p11 = scmp.ne.s32.totalorder %s62_s5, %s108_s6  ;;  %p113_p12 = scmp.lt.s32.totalorder %s62_s5, %s62_s5 }
  0x23   :  { %p114_p13 = scmp.lt.s32.totalorder %s112_s7, %s108_s6 }
  0x24   :  { %v38_v3 = vstv %s36_s30  ;;  %v43_v6 = vstv %s71_s3 }
  0x25   :  { %v39_v5 = vmul.f32 %v38_v3, %v37_v0  ;;  %v48_v7 = vstv %s72_s4  ;;  %v44_v8 = vmul.f32 %v43_v6, %v42_v1  ;;  %p115_p0 = por %p114_p13, %p113_p12 }
  0x26   :  { %v49_v10 = vmul.f32 %v48_v7, %v47_v4 }
  0x27   :  { %v40_v9 = vadd.f32 %v39_v5, %v35_v2  ;;  %p116_p1 = pnand %p115_p0, %p109_p11 }
  0x29   :  { %v45_v11 = vadd.f32 %v44_v8, %v40_v9 }
  0x2b   :  { %v50_v12 = vadd.f32 %v49_v10, %v45_v11 }
  0x2d   :  { %v51_v13 = vmax.f32 %v50_v12, 0.0 }
  0x2f   :  { %v52_v14 = vmin.f32 %v51_v13, 1.0 }
  0x31   :  { %54 = vst.msk [vmem:[#allocation7] sm:$0x1] %vm53_vm0, %v52_v14 }
  0x32   :  { %119 = shalt.err (!%p116_p1)
}
  0x33   :  { %s120_s10 = scalar_lea.hbm %s192_s2, 16 }
  0x34   :  { %p121_p2 = scmp.ne.s32.totalorder %s192_s2, %s120_s10  ;;  %p124_p3 = scmp.lt.u32.totalorder %s120_s10, %s192_s2 }
  0x36   :  { %p126_p4 = pnand %p124_p3, %p121_p2 }
  0x38   :  { %129 = shalt.err (!%p126_p4)
}
  0x39   :  { %64 = dma.vmem_to_hbm [thread:$0]  %s62_s5, 16, %s192_s2, [#allocation4]  }
  0x3a   :  { %134 = dma.done.wait [#allocation4], 16  }
  0x3b   :  { %135 = vsyncadd [#allocation4], 4294967280 }
  0x3c   :  { %68 = vsyncpa [#allocation3], 1 }
  0x3d   :  { %69 = vsyncpa [#allocation4], 1 }
  0x3e   :  { %70 = vsyncpa [#allocation5], 1 }

</bundles_post_ra>
